<compile_context>
chip_gen: v6e
topology: v6e:2x2x1
jax: 0.10.0
libtpu: 0.0.40
codegen_flags: <defaults>
</compile_context>

<pallas_src>
import functools

import jax
import jax.numpy as jnp
from jax.experimental import pallas as pl
from jax.experimental.pallas import tpu as pltpu

LANE = 128  # lane-dense output width for the final (H -> 1) layer


def _round_up(x, m):
    return (x + m - 1) // m * m


def qnet_kernel(s_ref, a_ref, w1s_ref, w1a_ref, b1_ref,
                w2_ref, b2_ref, w3_ref, b3_ref, o_ref):
    # Layer 1 with the concat fused away:
    #   cat(state, action) @ W1 == state @ W1[:Ds] + action @ W1[Ds:]
    h1 = jnp.dot(s_ref[...], w1s_ref[...], preferred_element_type=jnp.float32)
    h1 = h1 + jnp.dot(a_ref[...], w1a_ref[...],
                      preferred_element_type=jnp.float32)
    h1 = jnp.maximum(h1 + b1_ref[...], 0.0)                      # (TB, H)

    # Layer 2.
    h2 = jnp.dot(h1, w2_ref[...], preferred_element_type=jnp.float32)
    h2 = jnp.maximum(h2 + b2_ref[...], 0.0)                      # (TB, H)

    # Final layer against zero-padded (H, 128) weights -> unmasked lane-dense
    # store; only column 0 is meaningful and the wrapper slices it out.
    q = jnp.dot(h2, w3_ref[...], preferred_element_type=jnp.float32)
    o_ref[...] = (q + b3_ref[...]).astype(o_ref.dtype)           # (TB, 128)


def pack_params(params, num_inputs):
    """One-time conversion of logical params into kernel-ready params:
    split W1 along the input axis (fused concat) and zero-pad W3/b3 to 128
    output columns (lane-dense final store; only column 0 is meaningful)."""
    w1, b1, w2, b2, w3, b3 = params
    hidden = w1.shape[1]
    w1s = w1[:num_inputs, :]
    w1a = w1[num_inputs:, :]
    w3p = jnp.zeros((hidden, LANE), jnp.float32).at[:, :1].set(w3)
    b3p = jnp.zeros((1, LANE), jnp.float32).at[:, :1].set(b3)
    return (w1s, w1a, b1, w2, b2, w3p, b3p)


@functools.partial(jax.jit, static_argnames=("tile_b",))
def qnetwork_forward(state, action, kernel_params, tile_b=512):
    """Pallas-backed QNetwork forward.

    state : (B, num_inputs) float32
    action: (B, num_actions) float32
    kernel_params: output of pack_params().
    Returns (B, 1) float32 Q-values.
    """
    w1s, w1a, b1, w2, b2, w3p, b3p = kernel_params
    state = state.astype(jnp.float32)
    action = action.astype(jnp.float32)

    B, ds = state.shape
    da = action.shape[1]
    H = w2.shape[0]

    # Batch tile: multiple of 8, capped by the (rounded-up) batch itself.
    tile_b = max(8, _round_up(tile_b, 8))
    tile_b = min(tile_b, _round_up(B, 8))
    b_pad = _round_up(B, tile_b)
    if b_pad != B:
        pad = b_pad - B
        state = jnp.pad(state, ((0, pad), (0, 0)))
        action = jnp.pad(action, ((0, pad), (0, 0)))

    grid = (b_pad // tile_b,)

    def row_spec(cols):           # batch-tiled operands
        return pl.BlockSpec((tile_b, cols), lambda i: (i, 0))

    def const_spec(shape):        # VMEM-resident across all grid steps
        return pl.BlockSpec(shape, lambda i: (0, 0))

    flops = 2 * b_pad * (ds * H + da * H + H * H + H * LANE)
    bytes_accessed = 4 * (b_pad * (ds + da + LANE)
                          + (ds + da + H) * H + 2 * H + (H + 1) * LANE)

    out = pl.pallas_call(
        qnet_kernel,
        out_shape=jax.ShapeDtypeStruct((b_pad, LANE), jnp.float32),
        grid=grid,
        in_specs=[
            row_spec(ds),             # state tile
            row_spec(da),             # action tile
            const_spec((ds, H)),      # W1_s
            const_spec((da, H)),      # W1_a
            const_spec((1, H)),       # b1
            const_spec((H, H)),       # W2
            const_spec((1, H)),       # b2
            const_spec((H, LANE)),    # W3 (zero-padded)
            const_spec((1, LANE)),    # b3 (zero-padded)
        ],
        out_specs=row_spec(LANE),
        compiler_params=pltpu.CompilerParams(
            dimension_semantics=("parallel",)),
        cost_estimate=pl.CostEstimate(
            flops=flops, transcendentals=0, bytes_accessed=bytes_accessed),
    )(state, action, w1s, w1a, b1, w2, b2, w3p, b3p)

    return out[:B, :1]


def init_params(key, num_inputs, num_actions, hidden_dim):
    """PyTorch-style uniform(-1/sqrt(fan_in), 1/sqrt(fan_in)) init.
    Weights stored as (in_features, out_features) (transposed vs. PyTorch)."""
    d0 = num_inputs + num_actions
    ks = jax.random.split(key, 6)

    def lin(kw, kb, fan_in, fan_out):
        bound = 1.0 / jnp.sqrt(jnp.float32(fan_in))
        w = jax.random.uniform(kw, (fan_in, fan_out), jnp.float32, -bound, bound)
        b = jax.random.uniform(kb, (1, fan_out), jnp.float32, -bound, bound)
        return w, b

    w1, b1 = lin(ks[0], ks[1], d0, hidden_dim)
    w2, b2 = lin(ks[2], ks[3], hidden_dim, hidden_dim)
    w3, b3 = lin(ks[4], ks[5], hidden_dim, 1)
    return (w1, b1, w2, b2, w3, b3)


def reference_forward(state, action, params):
    w1, b1, w2, b2, w3, b3 = params
    x = jnp.concatenate([state, action], axis=1)
    x = jnp.maximum(x @ w1 + b1, 0.0)
    x = jnp.maximum(x @ w2 + b2, 0.0)
    return x @ w3 + b3


if __name__ == "__main__":
    num_inputs, num_actions, hidden_dim, batch = 24, 8, 32, 8

    key = jax.random.PRNGKey(0)
    k_state, k_action, k_params = jax.random.split(key, 3)

    state = jax.random.normal(k_state, (batch, num_inputs), jnp.float32)
    action = jax.random.normal(k_action, (batch, num_actions), jnp.float32)
    params = init_params(k_params, num_inputs, num_actions, hidden_dim)
    kparams = pack_params(params, num_inputs)

    out = qnetwork_forward(state, action, kparams)
    out = jax.block_until_ready(out)

    ref = reference_forward(state, action, params)
    assert out.shape == (batch, 1)
    assert jnp.allclose(out, ref, atol=1e-5, rtol=1e-5)

    # Exercise the multi-step, padded, parallel grid path (training-scale B).
    k_s2, k_a2 = jax.random.split(jax.random.PRNGKey(1), 2)
    state2 = jax.random.normal(k_s2, (520, num_inputs), jnp.float32)
    action2 = jax.random.normal(k_a2, (520, num_actions), jnp.float32)
    out2 = jax.block_until_ready(
        qnetwork_forward(state2, action2, kparams, tile_b=256))
    ref2 = reference_forward(state2, action2, params)
    assert out2.shape == (520, 1)
    assert jnp.allclose(out2, ref2, atol=1e-4, rtol=1e-4)

    print("KERNEL_OK")
</pallas_src>

<mosaic_0001>
module attributes {stable_mosaic.version = 11 : i64} {
  func.func @qnet_kernel(%arg0: i32, %arg1: memref<8x24xf32, #tpu.memory_space<vmem>>, %arg2: memref<8x8xf32, #tpu.memory_space<vmem>>, %arg3: memref<24x32xf32, #tpu.memory_space<vmem>>, %arg4: memref<8x32xf32, #tpu.memory_space<vmem>>, %arg5: memref<1x32xf32, #tpu.memory_space<vmem>>, %arg6: memref<32x32xf32, #tpu.memory_space<vmem>>, %arg7: memref<1x32xf32, #tpu.memory_space<vmem>>, %arg8: memref<32x128xf32, #tpu.memory_space<vmem>>, %arg9: memref<1x128xf32, #tpu.memory_space<vmem>>, %arg10: memref<8x128xf32, #tpu.memory_space<vmem>>) attributes {dimension_semantics = [#tpu.dimension_semantics<parallel>], iteration_bounds = array<i64: 1>, scalar_prefetch = 0 : i64, scratch_operands = 0 : i64, tpu.core_type = #tpu.core_type<tc>, window_params = [{transform_indices = @transform_0, window_bounds = array<i64: 8, 24>}, {transform_indices = @transform_1, window_bounds = array<i64: 8, 8>}, {pipeline_mode = #tpu.pipeline_mode<synchronous>, transform_indices = @transform_2, window_bounds = array<i64: 24, 32>}, {pipeline_mode = #tpu.pipeline_mode<synchronous>, transform_indices = @transform_3, window_bounds = array<i64: 8, 32>}, {pipeline_mode = #tpu.pipeline_mode<synchronous>, transform_indices = @transform_4, window_bounds = array<i64: 1, 32>}, {pipeline_mode = #tpu.pipeline_mode<synchronous>, transform_indices = @transform_5, window_bounds = array<i64: 32, 32>}, {pipeline_mode = #tpu.pipeline_mode<synchronous>, transform_indices = @transform_6, window_bounds = array<i64: 1, 32>}, {pipeline_mode = #tpu.pipeline_mode<synchronous>, transform_indices = @transform_7, window_bounds = array<i64: 32, 128>}, {pipeline_mode = #tpu.pipeline_mode<synchronous>, transform_indices = @transform_8, window_bounds = array<i64: 1, 128>}, {transform_indices = @transform_9, window_bounds = array<i64: 8, 128>}]} {
    %c0 = arith.constant 0 : index
    %c0_0 = arith.constant 0 : index
    %0 = vector.load %arg1[%c0, %c0_0] : memref<8x24xf32, #tpu.memory_space<vmem>>, vector<8x24xf32>
    %c0_1 = arith.constant 0 : index
    %c0_2 = arith.constant 0 : index
    %1 = vector.load %arg3[%c0_1, %c0_2] : memref<24x32xf32, #tpu.memory_space<vmem>>, vector<24x32xf32>
    %cst = arith.constant dense<0.000000e+00> : vector<8x32xf32>
    %2 = tpu.matmul %0, %1, %cst {dimension_numbers = #tpu.dot_dimension_numbers<[1], [0], [0], [1], [0, 0, 1, 1], [], []>} : vector<8x24xf32>, vector<24x32xf32>, vector<8x32xf32> -> vector<8x32xf32>
    %c0_3 = arith.constant 0 : index
    %c0_4 = arith.constant 0 : index
    %3 = vector.load %arg2[%c0_3, %c0_4] : memref<8x8xf32, #tpu.memory_space<vmem>>, vector<8x8xf32>
    %c0_5 = arith.constant 0 : index
    %c0_6 = arith.constant 0 : index
    %4 = vector.load %arg4[%c0_5, %c0_6] : memref<8x32xf32, #tpu.memory_space<vmem>>, vector<8x32xf32>
    %cst_7 = arith.constant dense<0.000000e+00> : vector<8x32xf32>
    %5 = tpu.matmul %3, %4, %cst_7 {dimension_numbers = #tpu.dot_dimension_numbers<[1], [0], [0], [1], [0, 0, 1, 1], [], []>} : vector<8x8xf32>, vector<8x32xf32>, vector<8x32xf32> -> vector<8x32xf32>
    %6 = arith.addf %2, %5 : vector<8x32xf32>
    %c0_8 = arith.constant 0 : index
    %c0_9 = arith.constant 0 : index
    %7 = vector.load %arg5[%c0_8, %c0_9] : memref<1x32xf32, #tpu.memory_space<vmem>>, vector<1x32xf32>
    %8 = vector.broadcast %7 : vector<1x32xf32> to vector<8x32xf32>
    %9 = arith.addf %6, %8 : vector<8x32xf32>
    %cst_10 = arith.constant 0.000000e+00 : f32
    %10 = vector.broadcast %cst_10 : f32 to vector<8x32xf32>
    %11 = arith.maximumf %9, %10 : vector<8x32xf32>
    %c0_11 = arith.constant 0 : index
    %c0_12 = arith.constant 0 : index
    %12 = vector.load %arg6[%c0_11, %c0_12] : memref<32x32xf32, #tpu.memory_space<vmem>>, vector<32x32xf32>
    %cst_13 = arith.constant dense<0.000000e+00> : vector<8x32xf32>
    %13 = tpu.matmul %11, %12, %cst_13 {dimension_numbers = #tpu.dot_dimension_numbers<[1], [0], [0], [1], [0, 0, 1, 1], [], []>} : vector<8x32xf32>, vector<32x32xf32>, vector<8x32xf32> -> vector<8x32xf32>
    %c0_14 = arith.constant 0 : index
    %c0_15 = arith.constant 0 : index
    %14 = vector.load %arg7[%c0_14, %c0_15] : memref<1x32xf32, #tpu.memory_space<vmem>>, vector<1x32xf32>
    %15 = vector.broadcast %14 : vector<1x32xf32> to vector<8x32xf32>
    %16 = arith.addf %13, %15 : vector<8x32xf32>
    %cst_16 = arith.constant 0.000000e+00 : f32
    %17 = vector.broadcast %cst_16 : f32 to vector<8x32xf32>
    %18 = arith.maximumf %16, %17 : vector<8x32xf32>
    %c0_17 = arith.constant 0 : index
    %c0_18 = arith.constant 0 : index
    %19 = vector.load %arg8[%c0_17, %c0_18] : memref<32x128xf32, #tpu.memory_space<vmem>>, vector<32x128xf32>
    %cst_19 = arith.constant dense<0.000000e+00> : vector<8x128xf32>
    %20 = tpu.matmul %18, %19, %cst_19 {dimension_numbers = #tpu.dot_dimension_numbers<[1], [0], [0], [1], [0, 0, 1, 1], [], []>} : vector<8x32xf32>, vector<32x128xf32>, vector<8x128xf32> -> vector<8x128xf32>
    %c0_20 = arith.constant 0 : index
    %c0_21 = arith.constant 0 : index
    %21 = vector.load %arg9[%c0_20, %c0_21] : memref<1x128xf32, #tpu.memory_space<vmem>>, vector<1x128xf32>
    %22 = vector.broadcast %21 : vector<1x128xf32> to vector<8x128xf32>
    %23 = arith.addf %20, %22 : vector<8x128xf32>
    %c0_22 = arith.constant 0 : index
    %c0_23 = arith.constant 0 : index
    %24 = vector.load %arg10[%c0_22, %c0_23] : memref<8x128xf32, #tpu.memory_space<vmem>>, vector<8x128xf32>
    tpu.vector_store %arg10[%c0_22, %c0_23], %23 {strides = array<i32>} : memref<8x128xf32, #tpu.memory_space<vmem>>, vector<8x128xf32>,
    return
  }
  func.func @transform_0(%arg0: i32) -> (i32, i32) {
    %c0_i32 = arith.constant 0 : i32
    %c0_i32_0 = arith.constant 0 : i32
    return %arg0, %c0_i32 : i32, i32
  }
  func.func @transform_1(%arg0: i32) -> (i32, i32) {
    %c0_i32 = arith.constant 0 : i32
    %c0_i32_0 = arith.constant 0 : i32
    return %arg0, %c0_i32 : i32, i32
  }
  func.func @transform_2(%arg0: i32) -> (i32, i32) {
    %c0_i32 = arith.constant 0 : i32
    %c0_i32_0 = arith.constant 0 : i32
    %c0_i32_1 = arith.constant 0 : i32
    return %c0_i32, %c0_i32_0 : i32, i32
  }
  func.func @transform_3(%arg0: i32) -> (i32, i32) {
    %c0_i32 = arith.constant 0 : i32
    %c0_i32_0 = arith.constant 0 : i32
    %c0_i32_1 = arith.constant 0 : i32
    return %c0_i32, %c0_i32_0 : i32, i32
  }
  func.func @transform_4(%arg0: i32) -> (i32, i32) {
    %c0_i32 = arith.constant 0 : i32
    %c0_i32_0 = arith.constant 0 : i32
    %c0_i32_1 = arith.constant 0 : i32
    return %c0_i32, %c0_i32_0 : i32, i32
  }
  func.func @transform_5(%arg0: i32) -> (i32, i32) {
    %c0_i32 = arith.constant 0 : i32
    %c0_i32_0 = arith.constant 0 : i32
    %c0_i32_1 = arith.constant 0 : i32
    return %c0_i32, %c0_i32_0 : i32, i32
  }
  func.func @transform_6(%arg0: i32) -> (i32, i32) {
    %c0_i32 = arith.constant 0 : i32
    %c0_i32_0 = arith.constant 0 : i32
    %c0_i32_1 = arith.constant 0 : i32
    return %c0_i32, %c0_i32_0 : i32, i32
  }
  func.func @transform_7(%arg0: i32) -> (i32, i32) {
    %c0_i32 = arith.constant 0 : i32
    %c0_i32_0 = arith.constant 0 : i32
    %c0_i32_1 = arith.constant 0 : i32
    return %c0_i32, %c0_i32_0 : i32, i32
  }
  func.func @transform_8(%arg0: i32) -> (i32, i32) {
    %c0_i32 = arith.constant 0 : i32
    %c0_i32_0 = arith.constant 0 : i32
    %c0_i32_1 = arith.constant 0 : i32
    return %c0_i32, %c0_i32_0 : i32, i32
  }
  func.func @transform_9(%arg0: i32) -> (i32, i32) {
    %c0_i32 = arith.constant 0 : i32
    %c0_i32_0 = arith.constant 0 : i32
    return %arg0, %c0_i32 : i32, i32
  }
}

</mosaic_0001>

<bundles_post_ra>
// kernel: qnetwork_forward.1
= control target key start
LH: loop header
LB: loop body
LE: loop exit
PB: predicated region body
PF: predicated region fallthrough
CT: control target
= control target key end

     0   :  { %14 = vsyncpa [#allocation3], 0  ;;  %s743_s0 = inlined_call_operand.hbm [shape: f32[8,24], index: 0, kind: input, shape index: {}]   ;;  %s744_s1 = inlined_call_operand.hbm [shape: f32[8,8], index: 1, kind: input, shape index: {}]   ;;  %s745_s2 = inlined_call_operand.hbm [shape: f32[24,32], index: 2, kind: input, shape index: {}]   ;;  %s746_s3 = inlined_call_operand.hbm [shape: f32[8,32], index: 3, kind: input, shape index: {}]   ;;  %s747_s4 = inlined_call_operand.vmem [shape: f32[1,32], index: 4, kind: input, shape index: {}]   ;;  %s748_s5 = inlined_call_operand.hbm [shape: f32[32,32], index: 5, kind: input, shape index: {}]   ;;  %s749_s6 = inlined_call_operand.vmem [shape: f32[1,32], index: 6, kind: input, shape index: {}]   ;;  %s750_s7 = inlined_call_operand.hbm [shape: f32[32,128], index: 7, kind: input, shape index: {}]   ;;  %s751_s8 = inlined_call_operand.vmem [shape: f32[1,128], index: 8, kind: input, shape index: {}]   ;;  %s752_s9 = inlined_call_operand.vmem [shape: f32[8,128], index: 9, kind: output, shape index: {}]  }
   0x1   :  { %15 = vsyncpa [#allocation5], 0 }
   0x2   :  { %16 = vsyncpa [#allocation8], 0 }
   0x3   :  { %17 = vsyncpa [#allocation11], 0  ;;  %s647_s30 = smov [#allocation4]   ;;  %s648_s11 = smov [#allocation7]  }
   0x4   :  { %s34_s10 = sshll.u32 %s647_s30, 4  ;;  %s56_s12 = sshll.u32 %s648_s11, 4  ;;  %s35_s10 = int_to_ptr.vmem [resolvable:$true] %s34_s10  ;;  %s57_s12 = int_to_ptr.vmem [resolvable:$true] %s56_s12 }
   0x5   :  { %s527_s13 = scalar_lea.vmem %s35_s10, 128  ;;  %p532_p1 = scmp.lt.s32.totalorder %s35_s10, %s35_s10 }
   0x6   :  { %p528_p0 = scmp.ne.s32.totalorder %s35_s10, %s527_s13  ;;  %p533_p2 = scmp.lt.s32.totalorder %s527_s13, %s527_s13 }
   0x8   :  { %p534_p3 = por %p533_p2, %p532_p1 }
   0xa   :  { %p535_p4 = pnand %p534_p3, %p528_p0 }
   0xc   :  { %538 = shalt.err (!%p535_p4)
}
   0xd   :  { %37 = dma.hbm_to_vmem [thread:$0]  %s744_s1, 128, %s35_s10, [#allocation5]  }
   0xe   :  { %s547_s16 = scalar_lea.vmem %s57_s12, 128  ;;  %p552_p6 = scmp.lt.s32.totalorder %s57_s12, %s57_s12 }
   0xf   :  { %p548_p5 = scmp.ne.s32.totalorder %s57_s12, %s547_s16  ;;  %p553_p7 = scmp.lt.s32.totalorder %s547_s16, %s547_s16 }
  0x11   :  { %p554_p8 = por %p553_p7, %p552_p6 }
  0x13   :  { %p555_p9 = pnand %p554_p8, %p548_p5 }
  0x15   :  { %558 = shalt.err (!%p555_p9)
}
  0x16   :  { %59 = dma.hbm_to_vmem [thread:$0]  %s746_s3, 128, %s57_s12, [#allocation8]  }
  0x17   :  { %s649_s19 = smov [#allocation2]   ;;  %s650_s21 = smov [#allocation6]  }
  0x18   :  { %s24_s20 = sshll.u32 %s649_s19, 4  ;;  %s43_s22 = sshll.u32 %s650_s21, 4  ;;  %s25_s20 = int_to_ptr.vmem [resolvable:$true] %s24_s20  ;;  %s44_s22 = int_to_ptr.vmem [resolvable:$true] %s43_s22 }
  0x19   :  { %s567_s23 = scalar_lea.vmem %s25_s20, 128  ;;  %p572_p11 = scmp.lt.s32.totalorder %s25_s20, %s25_s20 }
  0x1a   :  { %p568_p10 = scmp.ne.s32.totalorder %s25_s20, %s567_s23  ;;  %p573_p12 = scmp.lt.s32.totalorder %s567_s23, %s567_s23 }
  0x1c   :  { %p574_p13 = por %p573_p12, %p572_p11 }
  0x1e   :  { %p575_p0 = pnand %p574_p13, %p568_p10 }
  0x20   :  { %578 = shalt.err (!%p575_p0)
}
  0x21   :  { %27 = dma.hbm_to_vmem [thread:$0]  %s743_s0, 128, %s25_s20, [#allocation3]  }
  0x22   :  { %s587_s25 = scalar_lea.vmem %s44_s22, 384  ;;  %p592_p2 = scmp.lt.s32.totalorder %s44_s22, %s44_s22 }
  0x23   :  { %p588_p1 = scmp.ne.s32.totalorder %s44_s22, %s587_s25  ;;  %p593_p3 = scmp.lt.s32.totalorder %s587_s25, %s587_s25 }
  0x25   :  { %p594_p4 = por %p593_p3, %p592_p2 }
  0x27   :  { %p595_p5 = pnand %p594_p4, %p588_p1 }
  0x29   :  { %598 = shalt.err (!%p595_p5)
}
  0x2a   :  { %s651_s3 = smov 128   ;;  %s652_s26 = smov 8  }
  0x2b   :  { %49 = dma.hbm_to_vmem [thread:$0]  %s745_s2, 384, %s44_s22, [#allocation5], %s651_s3, %s651_s3, %s652_s26  }
  0x2c   :  { %s653_s29 = smov [#allocation9]   ;;  %s654_s10 = smov [#allocation10]  }
  0x2d   :  { %s67_s30 = sshll.u32 %s653_s29, 4  ;;  %s81_s11 = sshll.u32 %s654_s10, 4  ;;  %s68_s30 = int_to_ptr.vmem [resolvable:$true] %s67_s30  ;;  %s82_s11 = int_to_ptr.vmem [resolvable:$true] %s81_s11 }
  0x2e   :  { %s607_s0 = scalar_lea.vmem %s68_s30, 512  ;;  %p612_p7 = scmp.lt.s32.totalorder %s68_s30, %s68_s30 }
  0x2f   :  { %p608_p6 = scmp.ne.s32.totalorder %s68_s30, %s607_s0  ;;  %p613_p8 = scmp.lt.s32.totalorder %s607_s0, %s607_s0 }
  0x31   :  { %p614_p9 = por %p613_p8, %p612_p7 }
  0x33   :  { %p615_p10 = pnand %p614_p9, %p608_p6 }
  0x35   :  { %618 = shalt.err (!%p615_p10)
}
  0x36   :  { %73 = dma.hbm_to_vmem [thread:$0]  %s748_s5, 512, %s68_s30, [#allocation8], %s651_s3, %s651_s3, %s652_s26  }
  0x37   :  { %s627_s14 = scalar_lea.vmem %s82_s11, 512  ;;  %p632_p12 = scmp.lt.s32.totalorder %s82_s11, %s82_s11 }
  0x38   :  { %p628_p11 = scmp.ne.s32.totalorder %s82_s11, %s627_s14  ;;  %p633_p13 = scmp.lt.s32.totalorder %s627_s14, %s627_s14 }
  0x3a   :  { %p634_p0 = por %p633_p13, %p632_p12 }
  0x3c   :  { %p635_p1 = pnand %p634_p0, %p628_p11 }
  0x3e   :  { %638 = shalt.err (!%p635_p1)
}
  0x3f   :  { %87 = dma.hbm_to_vmem [thread:$0]  %s750_s7, 512, %s82_s11, [#allocation11], %s651_s3, %s651_s3, %s652_s26  }
  0x40   :  { %639 = dma.done.wait [#allocation3], 128  }
  0x41   :  { %640 = vsyncadd [#allocation3], 4294967168 }
  0x42   :  { %641 = dma.done.wait [#allocation5], 512  }
  0x43   :  { %642 = vsyncadd [#allocation5], 4294966784 }
  0x44   :  { %643 = dma.done.wait [#allocation8], 640  }
  0x45   :  { %644 = vsyncadd [#allocation8], 4294966656 }
  0x46   :  { %645 = dma.done.wait [#allocation11], 512  }
  0x47   :  { %646 = vsyncadd [#allocation11], 4294966784  ;;  %v655_v0 = vmov 0.0   ;;  %vm656_vm0 = vmmov 0   ;;  %vm114_vm1 = vcmask 64512   ;;  %v111_v1 = vld [vmem:[#allocation6 + $0x10] sm:$0xff] }
  0x48   :  { %478 = vmatprep.subr.mxu1 %v655_v0  ;;  %473 = vmatprep.subr.mxu0 %v655_v0  ;;  %v113_v2 = vld [vmem:[#allocation7] sm:$0xff]  ;;  %v110_v3 = vld [vmem:[#allocation6 + $0x8] sm:$0xff]  ;;  %v109_v5 = vld [vmem:[#allocation6] sm:$0xff]  ;;  %vm188_vm2 = vcmask 195584   ;;  %vm282_vm3 = vcmask 261120  }
  0x49   :  { %475 = vmatprep.mubr.msk.f32.mxu0 %vm656_vm0, %v655_v0  ;;  %484 = vmatprep.mubr.msk.f32.mxu1 %vm656_vm0, %v655_v0  ;;  %v112_v4 = vld [vmem:[#allocation4] sm:$0xff]  ;;  %v108_v6 = vld [vmem:[#allocation2] sm:$0xff]  ;;  %v272_v9 = vld [vmem:[#allocation9 + $0x8] sm:$0xff] }
  0x4a   :  { %479 = vmatpush3.msra.mxu1 %v111_v1  ;;  %474 = vmatpush3.msra.mxu0 %v113_v2  ;;  %v274_v7 = vld [vmem:[#allocation9 + $0x18] sm:$0xff]  ;;  %v273_v8 = vld [vmem:[#allocation9 + $0x10] sm:$0xff]  ;;  %v271_v10 = vld [vmem:[#allocation9] sm:$0xff] }
  0x4b   :  { %480 = vmatprep.subr.mxu1 %v655_v0  ;;  %476 = vmatmul.mubr.msk.f32.vlgmr.msra.gmra.mxu0 %vm114_vm1, %v112_v4  ;;  %v360_v11 = vld [vmem:[#allocation10 + $0x18] sm:$0xff]  ;;  %v452_v15 = vld [vmem:[%s747_s4] ss:$0 sm:$0xff]  ;;  %v358_v21 = vld [vmem:[#allocation10 + $0x8] sm:$0xff] }
  0x4c   :  { %481 = vmatpush3.msra.mxu1 %v110_v3  ;;  %487 = vmatprep.subr.mxu0 %v655_v0  ;;  %v359_v20 = vld [vmem:[#allocation10 + $0x10] sm:$0xff]  ;;  %v357_v22 = vld [vmem:[#allocation10] sm:$0xff] }
  0x4d   :  { %482 = vmatprep.subr.mxu1 %v655_v0  ;;  %495 = vmatprep.mubr.msk.f32.mxu0 %vm656_vm0, %v655_v0  ;;  %v453_v23 = vld [vmem:[%s749_s6] ss:$0 sm:$0xff] }
  0x4e   :  { %483 = vmatpush3.msra.mxu1 %v109_v5  ;;  %488 = vmatpush3.msra.mxu0 %v274_v7  ;;  %v455_v28 = vld [vmem:[%s751_s8] ss:$0 sm:$0xff] }
  0x4f   :  { %485 = vmatmul.mubr.msk.f32.vlgmr.msra.gmra.mxu1 %vm188_vm2, %v108_v6  ;;  %498 = vmatprep.subr.mxu1 %v655_v0 }
  0x50   :  { %506 = vmatprep.mubr.msk.f32.mxu1 %vm656_vm0, %v655_v0  ;;  %489 = vmatprep.subr.mxu0 %v655_v0 }
  0x51   :  { %490 = vmatpush3.msra.mxu0 %v273_v8  ;;  %499 = vmatpush3.msra.mxu1 %v360_v11 }
  0x52   :  { %491 = vmatprep.subr.mxu0 %v655_v0  ;;  %500 = vmatprep.subr.mxu1 %v655_v0 }
  0x53   :  { %492 = vmatpush3.msra.mxu0 %v272_v9  ;;  %501 = vmatpush3.msra.mxu1 %v359_v20 }
  0x54   :  { %493 = vmatprep.subr.mxu0 %v655_v0  ;;  %502 = vmatprep.subr.mxu1 %v655_v0 }
  0x55   :  { %494 = vmatpush3.msra.mxu0 %v271_v10  ;;  %503 = vmatpush3.msra.mxu1 %v358_v21 }
  0x56   :  { %504 = vmatprep.subr.mxu1 %v655_v0 }
  0x57   :  { %505 = vmatpush3.msra.mxu1 %v357_v22 }
 0x10b   :  { %v184_v12 = vpop.f32.mrf.mxu0 }
 0x10d   :  { %v477_v13 = vpop.f32.mrf.mxu0 }
 0x10f   :  { %v258_v14 = vpop.f32.mrf.mxu1 }
 0x110   :  { %v259_v16 = vadd.f32 %v258_v14, %v184_v12 }
 0x111   :  { %v486_v17 = vpop.f32.mrf.mxu1 }
 0x112   :  { %v269_v18 = vadd.f32 %v452_v15, %v259_v16 }
 0x114   :  { %v270_v19 = vmax.f32 %v269_v18, 0.0 }
 0x116   :  { %496 = vmatmul.mubr.msk.f32.vlgmr.msra.gmra.mxu0 %vm282_vm3, %v270_v19 }
 0x1d6   :  { %v352_v24 = vpop.f32.mrf.mxu0 }
 0x1d7   :  { %v353_v25 = vadd.f32 %v453_v23, %v352_v24 }
 0x1d8   :  { %v497_v26 = vpop.f32.mrf.mxu0 }
 0x1d9   :  { %v356_v27 = vmax.f32 %v353_v25, 0.0 }
 0x1db   :  { %507 = vmatmul.mubr.msk.f32.vlgmr.msra.gmra.mxu1 %vm282_vm3, %v356_v27 }
 0x29b   :  { %v437_v29 = vpop.f32.mrf.mxu1 }
 0x29c   :  { %v438_v30 = vadd.f32 %v455_v28, %v437_v29 }
 0x29d   :  { %v508_v31 = vpop.f32.mrf.mxu1 }
 0x29e   :  { %441 = vst [vmem:[%s752_s9] sm:$0xff] %v438_v30 }
 0x29f   :  { %446 = vsyncpa [#allocation3], 1 }
 0x2a0   :  { %447 = vsyncpa [#allocation5], 1 }
 0x2a1   :  { %448 = vsyncpa [#allocation8], 1 }
 0x2a2   :  { %449 = vsyncpa [#allocation11], 1 }

</bundles_post_ra>
